<compile_context>
chip_gen: v5e
topology: v5e:2x2
jax: 0.10.0
libtpu: 0.0.40
codegen_flags: <defaults>
</compile_context>

<pallas_src>
import functools

import jax
import jax.numpy as jnp
from jax.experimental import pallas as pl
from jax.experimental.pallas import tpu as pltpu


def _align_kernel(e1_ref, e2_ref, o_ref, *, p):
    d = e1_ref[...].astype(jnp.float32) - e2_ref[...].astype(jnp.float32)
    if p == 1.0:
        nrm = jnp.sum(jnp.abs(d), axis=1)
    elif p == 2.0:
        nrm = jnp.sqrt(jnp.sum(d * d, axis=1))
    elif p == float("inf"):
        nrm = jnp.max(jnp.abs(d), axis=1)
    else:
        a = jnp.abs(d)
        nrm = jnp.sum(a ** jnp.float32(p), axis=1) ** jnp.float32(1.0 / p)
    # (tb,) -> (1, tb): lane-dense, unmasked store.
    o_ref[...] = (-nrm)[None, :].astype(o_ref.dtype)


def _pick_tb(B, row_bytes):
    """Batch tile: ~2 MiB per input block, >= 8 grid steps when possible,
    and tb a multiple of 128 so the lane-dense output block is aligned."""
    target_rows = max(128, (2 << 20) // max(int(row_bytes), 1))
    cap = min(B, target_rows, max(128, B // 8))
    t = (cap // 128) * 128
    while t >= 128:
        if B % t == 0:
            return t
        t -= 128
    return B  # small / awkward batch: single full-extent block


def align_forward(e1, e2, *, p=2.0, tb=None):
    """Align.forward: returns -norm(e1 - e2, p, dim=1). e1, e2: (B, D)."""
    assert e1.shape == e2.shape and e1.ndim == 2
    B, D = e1.shape
    if tb is None:
        tb = _pick_tb(B, D * e1.dtype.itemsize)
    assert B % tb == 0, (B, tb)
    assert tb == B or tb % 128 == 0, tb  # keeps input/output blocks (8,128)-aligned

    kernel = functools.partial(_align_kernel, p=float(p))
    out = pl.pallas_call(
        kernel,
        out_shape=jax.ShapeDtypeStruct((1, B), e1.dtype),
        grid_spec=pltpu.PrefetchScalarGridSpec(
            num_scalar_prefetch=0,
            grid=(B // tb,),
            in_specs=[
                pl.BlockSpec((tb, D), lambda i: (i, 0)),
                pl.BlockSpec((tb, D), lambda i: (i, 0)),
            ],
            out_specs=pl.BlockSpec((1, tb), lambda i: (0, i)),
        ),
        compiler_params=pltpu.CompilerParams(dimension_semantics=("parallel",)),
    )(e1, e2)
    return out[0]


def align_forward_ref(e1, e2, p=2.0):
    d = (e1 - e2).astype(jnp.float32)
    a = jnp.abs(d)
    if p == 1.0:
        return -jnp.sum(a, axis=1)
    if p == 2.0:
        return -jnp.sqrt(jnp.sum(d * d, axis=1))
    if p == float("inf"):
        return -jnp.max(a, axis=1)
    return -jnp.sum(a ** p, axis=1) ** (1.0 / p)


if __name__ == "__main__":
    key = jax.random.PRNGKey(0)
    B, D = 1024, 256  # small demo; tb -> 128, grid -> 8 pipelined "parallel" steps
    k1, k2 = jax.random.split(key)
    e1 = jax.random.normal(k1, (B, D), dtype=jnp.float32)
    e2 = jax.random.normal(k2, (B, D), dtype=jnp.float32)

    # p = 2 (Euclidean, the usual Align setting)
    out2 = jax.block_until_ready(align_forward(e1, e2, p=2.0))
    ref2 = align_forward_ref(e1, e2, p=2.0)
    assert out2.shape == (B,)
    assert jnp.allclose(out2, ref2, atol=1e-4, rtol=1e-4)

    # p = 1 (Manhattan)
    out1 = jax.block_until_ready(align_forward(e1, e2, p=1.0))
    ref1 = align_forward_ref(e1, e2, p=1.0)
    assert jnp.allclose(out1, ref1, atol=1e-3, rtol=1e-4)

    # bf16 storage path (upcast to f32 inside the kernel); loose tolerance.
    out_bf = jax.block_until_ready(
        align_forward(e1.astype(jnp.bfloat16), e2.astype(jnp.bfloat16), p=2.0)
    )
    assert out_bf.shape == (B,)
    assert jnp.allclose(out_bf.astype(jnp.float32), ref2, atol=0.5, rtol=5e-2)

    print("KERNEL_OK")
</pallas_src>

<mosaic_0001>
module attributes {stable_mosaic.version = 11 : i64} {
  func.func @_align_kernel(%arg0: i32, %arg1: memref<128x256xf32, #tpu.memory_space<vmem>>, %arg2: memref<128x256xf32, #tpu.memory_space<vmem>>, %arg3: memref<1x128xf32, #tpu.memory_space<vmem>>) attributes {dimension_semantics = [#tpu.dimension_semantics<parallel>], iteration_bounds = array<i64: 8>, scalar_prefetch = 0 : i64, scratch_operands = 0 : i64, tpu.core_type = #tpu.core_type<tc>, window_params = [{transform_indices = @transform_0, window_bounds = array<i64: 128, 256>}, {transform_indices = @transform_1, window_bounds = array<i64: 128, 256>}, {transform_indices = @transform_2, window_bounds = array<i64: 1, 128>}]} {
    %c0 = arith.constant 0 : index
    %c0_0 = arith.constant 0 : index
    %0 = vector.load %arg1[%c0, %c0_0] : memref<128x256xf32, #tpu.memory_space<vmem>>, vector<128x256xf32>
    %c0_1 = arith.constant 0 : index
    %c0_2 = arith.constant 0 : index
    %1 = vector.load %arg2[%c0_1, %c0_2] : memref<128x256xf32, #tpu.memory_space<vmem>>, vector<128x256xf32>
    %2 = arith.subf %0, %1 : vector<128x256xf32>
    %3 = arith.mulf %2, %2 : vector<128x256xf32>
    %cst = arith.constant dense<0.000000e+00> : vector<128xf32>
    %4 = vector.multi_reduction <add>, %3, %cst [1] : vector<128x256xf32> to vector<128xf32>
    %5 = math.sqrt %4 : vector<128xf32>
    %cst_3 = arith.constant 0.000000e+00 : f32
    %6 = vector.broadcast %cst_3 : f32 to vector<128xf32>
    %7 = arith.subf %6, %5 : vector<128xf32>
    %8 = vector.shape_cast %7 : vector<128xf32> to vector<1x128xf32>
    %c0_4 = arith.constant 0 : index
    %c0_5 = arith.constant 0 : index
    %9 = vector.load %arg3[%c0_4, %c0_5] : memref<1x128xf32, #tpu.memory_space<vmem>>, vector<1x128xf32>
    tpu.vector_store %arg3[%c0_4, %c0_5], %8 {strides = array<i32>} : memref<1x128xf32, #tpu.memory_space<vmem>>, vector<1x128xf32>,
    return
  }
  func.func @transform_0(%arg0: i32) -> (i32, i32) {
    %c0_i32 = arith.constant 0 : i32
    %c0_i32_0 = arith.constant 0 : i32
    return %arg0, %c0_i32 : i32, i32
  }
  func.func @transform_1(%arg0: i32) -> (i32, i32) {
    %c0_i32 = arith.constant 0 : i32
    %c0_i32_0 = arith.constant 0 : i32
    return %arg0, %c0_i32 : i32, i32
  }
  func.func @transform_2(%arg0: i32) -> (i32, i32) {
    %c0_i32 = arith.constant 0 : i32
    %c0_i32_0 = arith.constant 0 : i32
    return %c0_i32, %arg0 : i32, i32
  }
}

</mosaic_0001>

<bundles_post_ra>
// kernel: tpu_custom_call.1
= control target key start
LH: loop header
LB: loop body
LE: loop exit
PB: predicated region body
PF: predicated region fallthrough
CT: control target
= control target key end

     0   :  { %7 = vsyncpa [#allocation3], 0  ;;  %s1536_s0 = inlined_call_operand.hbm [shape: f32[1024,256], index: 0, kind: input, shape index: {}]   ;;  %s1537_s1 = inlined_call_operand.hbm [shape: f32[1024,256], index: 1, kind: input, shape index: {}]   ;;  %s1538_s2 = inlined_call_operand.hbm [shape: f32[1,1024], index: 2, kind: output, shape index: {}]  }
   0x1   :  { %9 = vsyncpa [#allocation3 + $0x1], 0 }
   0x2   :  { %10 = vsyncpa [#allocation6], 0 }
   0x3   :  { %12 = vsyncpa [#allocation6 + $0x1], 0 }
   0x4   :  { %13 = vsyncpa [#allocation4], 0 }
   0x5   :  { %15 = vsyncpa [#allocation4 + $0x1], 0  ;;  %s1030_s9 = smov 0   ;;  %s1032_s10 = smov 0  }
   0x6   :  { %s1034_s11 = smov 0   ;;  %s1036_s12 = smov 0  }
   0x7 LB: > { %s1051_s13 = sadd.s32 4294967295, %s1011_s12   ;;  %s776_s14 = sadd.s32 4294967294, %s1011_s12   ;;  %s1011_s12 = sphi %s1036_s12, %s1548_s12   ;;  %s1007_s11 = sphi %s1034_s11, %s1547_s11   ;;  %s1003_s10 = sphi %s1032_s10, %s1546_s10   ;;  %s999_s9 = sphi %s1030_s9, %s1545_s9  }
   0x8   : > { %s1055_s15 = sadd.s32 1, %s1011_s12   ;;  %s28_s16 = sadd.s32 1, %s1007_s11 }
   0x9   : > { %s25_s17 = ssub.s32 %s1011_s12, %s1055_s15  ;;  %p35_p0 = scmp.ne.s32.totalorder %s1007_s11, %s1003_s10 }
   0xa   : > { %p26_p1 = scmp.eq.s32.totalorder %s25_s17, 0  ;;  %p36_p2 = scmp.eq.s32.totalorder %s1011_s12, 0 }
   0xb   : > { %p41_p3 = scmp.ne.s32.totalorder %s1003_s10, %s999_s9  ;;  %p42_p4 = scmp.eq.s32.totalorder %s1051_s13, 0 }
   0xc   : > { %s1067_s18 = scalar_select %p26_p1, %s1007_s11, %s28_s16  }
   0xd   : > { %p1069_p5 = por %p36_p2, %p35_p0  ;;  %p1073_p6 = por %p42_p4, %p41_p3 }
   0xe   : > { %p91_p7 = scmp.eq.s32.totalorder %s1051_s13, 7  ;;  %p97_p8 = scmp.eq.s32.totalorder %s776_s14, 7 }
   0xf   : > { %p813_p9 = scmp.lt.s32.totalorder %s1011_s12, 8  ;;  %s1088_s23 = sand.u32 1, %s1007_s11  }
  0x10   : > { %p1079_p10 = por %p91_p7, %p35_p0  ;;  %p1083_p11 = por %p97_p8, %p41_p3 }
  0x11   : > { %s793_s24 = sshll.u32 %s1011_s12, 8  ;;  %s779_s25 = sshll.u32 %s1088_s23, 8 }
  0x12   : > { %s127_s28 = scalar_lea.hbm %s1536_s0, %s793_s24  ;;  %s121_s30 = scalar_lea.vmem [#allocation2], %s779_s25 }
  0x13   : > { %s128_s29 = sshll.u32 %s127_s28, 4  ;;  %s130_s3 = sshll.u32 %s121_s30, 4  ;;  %s129_s29 = int_to_ptr.hbm [resolvable:$true] %s128_s29  ;;  %s131_s3 = int_to_ptr.vmem [resolvable:$true] %s130_s3 }
  0x14   : > { %p1101_p12 = pnand %p813_p9, %p1069_p5  ;;  %p787_p13 = scmp.ge.s32.totalorder %s1011_s12, 1 }
  0x15   : > { %p161_p0 = scmp.lt.s32.totalorder %s1011_s12, 9  ;;  %s118_s5 = scalar_lea.sflag [#allocation3], %s1088_s23 }
  0x16   : > { %s881_s6 = sshra.s32 %s129_s29, 4  ;;  %p885_p2 = pneg %p1101_p12  ;;  %s882_s6 = int_to_ptr.hbm [resolvable:$true] %s881_s6 }
  0x17   : > { %s883_s7 = scalar_lea.hbm %s882_s6, 256  ;;  %s888_s16 = scalar_lea.hbm %s1536_s0, 2048 }
  0x18   : > { %p884_p1 = scmp.ne.s32.totalorder %s882_s6, %s883_s7  ;;  %p889_p5 = scmp.lt.s32.totalorder %s882_s6, %s1536_s0 }
  0x19   : > { %p890_p7 = scmp.lt.s32.totalorder %s888_s16, %s883_s7 }
  0x1a   : > { %p886_p3 = pnand %p885_p2, %p884_p1 }
  0x1b   : > { %p891_p8 = por %p890_p7, %p889_p5 }
  0x1c   : > { %p887_p4 = pneg %p886_p3 }
  0x1e   : > { %p892_p9 = pnand %p891_p8, %p887_p4 }
  0x20   : > { %895 = shalt.err (!%p892_p9)
}
  0x21   : > { %s1013_s26 = smov 256   ;;  %s1014_s27 = smov 16  }
  0x22   : > { %805 = dma.hbm_to_vmem [thread:$0]  (!%p1101_p12), %s129_s29, 4096, %s131_s3, %s118_s5, %s1013_s26, %s1013_s26, %s1014_s27  }
  0x23   : > { %p1125_p1 = pnand %p787_p13, %p161_p0  ;;  %s150_s7 = scalar_lea.hbm %s1537_s1, %s793_s24 }
  0x24   : > { %s151_s8 = sshll.u32 %s150_s7, 4  ;;  %s144_s14 = scalar_lea.vmem [#allocation5], %s779_s25  ;;  %s152_s8 = int_to_ptr.hbm [resolvable:$true] %s151_s8 }
  0x25   : > { %s153_s16 = sshll.u32 %s144_s14, 4  ;;  %s141_s17 = scalar_lea.sflag [#allocation6], %s1088_s23  ;;  %s154_s16 = int_to_ptr.vmem [resolvable:$true] %s153_s16 }
  0x26   : > { %s911_s19 = sshra.s32 %s152_s8, 4  ;;  %s918_s30 = scalar_lea.hbm %s1537_s1, 2048  ;;  %s912_s19 = int_to_ptr.hbm [resolvable:$true] %s911_s19 }
  0x27   : > { %s913_s29 = scalar_lea.hbm %s912_s19, 256  ;;  %p919_p4 = scmp.lt.s32.totalorder %s912_s19, %s1537_s1 }
  0x28   : > { %p914_p3 = scmp.ne.s32.totalorder %s912_s19, %s913_s29  ;;  %p920_p5 = scmp.lt.s32.totalorder %s918_s30, %s913_s29 }
  0x2a   : > { %p916_p13 = pnand %p914_p3, %p885_p2  ;;  %p921_p7 = por %p920_p5, %p919_p4 }
  0x2c   : > { %p917_p0 = pneg %p916_p13 }
  0x2e   : > { %p922_p8 = pnand %p921_p7, %p917_p0 }
  0x30   : > { %925 = shalt.err (!%p922_p8)
}
  0x31   : > { %808 = dma.hbm_to_vmem [thread:$0]  (!%p1101_p12), %s152_s8, 4096, %s154_s16, %s141_s17, %s1013_s26, %s1013_s26, %s1014_s27  }
  0x32   : > { %165 = sbr.rel (%p1125_p1) target bundleno = 261 (0x105), region = 28  ;;  %s1151_s23 = sand.u32 (!%p1125_p1), 1, %s1003_s10  }
  0x33   : > { %s788_s25 = sshll.u32 (!%p1125_p1), %s1151_s23, 8  ;;  %s168_s7 = scalar_lea.sflag (!%p1125_p1), [#allocation3], %s1151_s23 }
  0x34   : > { %s1155_s14 = scalar_lea.vmem (!%p1125_p1), [#allocation2], %s788_s25 }
  0x37   : > { %986 = dma.done.wait (%p1073_p6), %s168_s7, 4096  }
  0x38   : > { %988 = vsyncadd (%p1073_p6), %s168_s7, 4294963200  ;;  %s178_s4 = scalar_lea.sflag [#allocation6], %s1151_s23  ;;  %s1162_s26 = scalar_lea.vmem [#allocation5], %s788_s25 }
  0x39   : > { %990 = dma.done.wait (%p1073_p6), %s178_s4, 4096  }
  0x3a   : > { %992 = vsyncadd (%p1073_p6), %s178_s4, 4294963200  ;;  %v217_v0 = vld [vmem:[%s1155_s14 + $0x40] sm:$0xff]  ;;  %v218_v1 = vld [vmem:[%s1155_s14 + $0x48] sm:$0xff]  ;;  %vm614_vm11 = vcmask 130112   ;;  %vm618_vm13 = vcmask 195712   ;;  %vm622_vm14 = vcmask 261312   ;;  %s683_s28 = scalar_lea.hbm %s1538_s2, %s1051_s13 }
  0x3b   : > { %v249_v2 = vld [vmem:[%s1162_s26 + $0x40] sm:$0xff]  ;;  %v250_v3 = vld [vmem:[%s1162_s26 + $0x48] sm:$0xff]  ;;  %v219_v20 = vld [vmem:[%s1155_s14 + $0x50] sm:$0xff]  ;;  %s206_s8 = scalar_lea.vmem [#allocation7], %s1151_s23  ;;  %s687_s16 = sshll.u32 %s683_s28, 4  ;;  %s688_s16 = int_to_ptr.hbm [resolvable:$true] %s687_s16 }
  0x3c   : > { %v281_v4 = vsub.f32 %v217_v0, %v249_v2  ;;  %v213_v5 = vld [vmem:[%s1155_s14 + $0x20] sm:$0xff]  ;;  %v214_v6 = vld [vmem:[%s1155_s14 + $0x28] sm:$0xff]  ;;  %v282_v7 = vsub.f32 %v218_v1, %v250_v3  ;;  %v220_v21 = vld [vmem:[%s1155_s14 + $0x58] sm:$0xff]  ;;  %s685_s13 = sshll.u32 %s206_s8, 4  ;;  %s675_s17 = scalar_lea.sflag [#allocation4], %s1151_s23  ;;  %s686_s13 = int_to_ptr.vmem [resolvable:$true] %s685_s13 }
  0x3d   : > { %v245_v8 = vld [vmem:[%s1162_s26 + $0x20] sm:$0xff]  ;;  %v246_v9 = vld [vmem:[%s1162_s26 + $0x28] sm:$0xff]  ;;  %v251_v22 = vld [vmem:[%s1162_s26 + $0x50] sm:$0xff]  ;;  %s955_s19 = sshra.s32 %s688_s16, 4  ;;  %s961_s30 = scalar_lea.hbm %s1538_s2, 8  ;;  %s956_s19 = int_to_ptr.hbm [resolvable:$true] %s955_s19 }
  0x3e   : > { %v209_v10 = vld [vmem:[%s1155_s14] sm:$0xff]  ;;  %v313_v11 = vmul.f32 %v281_v4, %v281_v4  ;;  %v277_v12 = vsub.f32 %v213_v5, %v245_v8  ;;  %v278_v13 = vsub.f32 %v214_v6, %v246_v9  ;;  %v210_v14 = vld [vmem:[%s1155_s14 + $0x8] sm:$0xff]  ;;  %v314_v17 = vmul.f32 %v282_v7, %v282_v7  ;;  %v252_v25 = vld [vmem:[%s1162_s26 + $0x58] sm:$0xff]  ;;  %s957_s29 = scalar_lea.hbm %s956_s19, 1  ;;  %p962_p9 = scmp.lt.s32.totalorder %s956_s19, %s1538_s2 }
  0x3f   : > { %v241_v15 = vld [vmem:[%s1162_s26] sm:$0xff]  ;;  %v242_v16 = vld [vmem:[%s1162_s26 + $0x8] sm:$0xff]  ;;  %v283_v26 = vsub.f32 %v219_v20, %v251_v22  ;;  %v215_v27 = vld [vmem:[%s1155_s14 + $0x30] sm:$0xff]  ;;  %v284_v32 = vsub.f32 %v220_v21, %v252_v25  ;;  %p958_p6 = scmp.ne.s32.totalorder %s956_s19, %s957_s29  ;;  %p963_p1 = scmp.lt.s32.totalorder %s961_s30, %s957_s29 }
  0x40   : > { %v273_v18 = vsub.f32 %v209_v10, %v241_v15  ;;  %v274_v19 = vsub.f32 %v210_v14, %v242_v16  ;;  %v309_v23 = vmul.f32 %v277_v12, %v277_v12  ;;  %v310_v24 = vmul.f32 %v278_v13, %v278_v13  ;;  %v216_v28 = vld [vmem:[%s1155_s14 + $0x38] sm:$0xff]  ;;  %v247_v33 = vld [vmem:[%s1162_s26 + $0x30] sm:$0xff]  ;;  %v225_v47 = vld [vmem:[%s1155_s14 + $0x80] sm:$0xff] }
  0x41   : > { %v349_v29 = vadd.f32 %v314_v17, %v313_v11  ;;  %v248_v34 = vld [vmem:[%s1162_s26 + $0x38] sm:$0xff]  ;;  %v211_v35 = vld [vmem:[%s1155_s14 + $0x10] sm:$0xff]  ;;  %v315_v37 = vmul.f32 %v283_v26, %v283_v26  ;;  %v279_v38 = vsub.f32 %v215_v27, %v247_v33  ;;  %v316_v44 = vmul.f32 %v284_v32, %v284_v32  ;;  %v226_v48 = vld [vmem:[%s1155_s14 + $0x88] sm:$0xff]  ;;  %p959_p12 = pnand %p958_p6, %p1079_p10  ;;  %p964_p3 = por %p963_p1, %p962_p9 }
  0x42   : > { %v305_v30 = vmul.f32 %v273_v18, %v273_v18  ;;  %v306_v31 = vmul.f32 %v274_v19, %v274_v19  ;;  %v343_v36 = vadd.f32 %v310_v24, %v309_v23  ;;  %v280_v39 = vsub.f32 %v216_v28, %v248_v34  ;;  %v212_v40 = vld [vmem:[%s1155_s14 + $0x18] sm:$0xff]  ;;  %v243_v41 = vld [vmem:[%s1162_s26 + $0x10] sm:$0xff]  ;;  %v257_v49 = vld [vmem:[%s1162_s26 + $0x80] sm:$0xff] }
  0x43   : > { %v244_v42 = vld [vmem:[%s1162_s26 + $0x18] sm:$0xff]  ;;  %350 = vadd.xlane.f32.xlu2 %v349_v29  ;;  %v275_v45 = vsub.f32 %v211_v35, %v243_v41  ;;  %v311_v50 = vmul.f32 %v279_v38, %v279_v38  ;;  %v258_v52 = vld [vmem:[%s1162_s26 + $0x88] sm:$0xff]  ;;  %v223_v53 = vld [vmem:[%s1155_s14 + $0x70] sm:$0xff]  ;;  %v352_v63 = vadd.f32 %v316_v44, %v315_v37  ;;  %v289_v0 = vsub.f32 %v225_v47, %v257_v49  ;;  %p960_p2 = pneg %p959_p12 }
  0x44   : > { %v337_v43 = vadd.f32 %v306_v31, %v305_v30  ;;  %v276_v46 = vsub.f32 %v212_v40, %v244_v42  ;;  %344 = vadd.xlane.f32.xlu1 %v343_v36  ;;  %v312_v51 = vmul.f32 %v280_v39, %v280_v39  ;;  %v224_v54 = vld [vmem:[%s1155_s14 + $0x78] sm:$0xff]  ;;  %v255_v57 = vld [vmem:[%s1162_s26 + $0x70] sm:$0xff]  ;;  %v221_v59 = vld [vmem:[%s1155_s14 + $0x60] sm:$0xff]  ;;  %v290_v1 = vsub.f32 %v226_v48, %v258_v52 }
  0x45   : > { %v307_v55 = vmul.f32 %v275_v45, %v275_v45  ;;  %v256_v58 = vld [vmem:[%s1162_s26 + $0x78] sm:$0xff]  ;;  %v222_v60 = vld [vmem:[%s1155_s14 + $0x68] sm:$0xff]  ;;  %v253_v61 = vld [vmem:[%s1162_s26 + $0x60] sm:$0xff]  ;;  %v287_v3 = vsub.f32 %v223_v53, %v255_v57  ;;  %v321_v8 = vmul.f32 %v289_v0, %v289_v0  ;;  %p965_p13 = pnand %p964_p3, %p960_p2 }
  0x46   : > { %338 = vadd.xlane.f32.xlu0 %v337_v43  ;;  %v308_v56 = vmul.f32 %v276_v46, %v276_v46  ;;  %v254_v62 = vld [vmem:[%s1162_s26 + $0x68] sm:$0xff]  ;;  %v346_v2 = vadd.f32 %v312_v51, %v311_v50  ;;  %v288_v4 = vsub.f32 %v224_v54, %v256_v58  ;;  %v285_v6 = vsub.f32 %v221_v59, %v253_v61  ;;  %v231_v10 = vld [vmem:[%s1155_s14 + $0xb0] sm:$0xff]  ;;  %v232_v11 = vld [vmem:[%s1155_s14 + $0xb8] sm:$0xff] }
  0x47   : > { %v286_v7 = vsub.f32 %v222_v60, %v254_v62  ;;  %v322_v9 = vmul.f32 %v290_v1, %v290_v1  ;;  %v263_v12 = vld [vmem:[%s1162_s26 + $0xb0] sm:$0xff]  ;;  %v319_v13 = vmul.f32 %v287_v3, %v287_v3  ;;  %v264_v15 = vld [vmem:[%s1162_s26 + $0xb8] sm:$0xff]  ;;  %v229_v16 = vld [vmem:[%s1155_s14 + $0xa0] sm:$0xff] }
  0x48   : > { %v340_v5 = vadd.f32 %v308_v56, %v307_v55  ;;  %v320_v14 = vmul.f32 %v288_v4, %v288_v4  ;;  %v230_v17 = vld [vmem:[%s1155_s14 + $0xa8] sm:$0xff]  ;;  %v317_v18 = vmul.f32 %v285_v6, %v285_v6  ;;  %v261_v20 = vld [vmem:[%s1162_s26 + $0xa0] sm:$0xff]  ;;  %v227_v22 = vld [vmem:[%s1155_s14 + $0x90] sm:$0xff]  ;;  %v295_v27 = vsub.f32 %v231_v10, %v263_v12 }
  0x49   : > { %v318_v19 = vmul.f32 %v286_v7, %v286_v7  ;;  %v262_v21 = vld [vmem:[%s1162_s26 + $0xa8] sm:$0xff]  ;;  %v228_v23 = vld [vmem:[%s1155_s14 + $0x98] sm:$0xff]  ;;  %v259_v24 = vld [vmem:[%s1162_s26 + $0x90] sm:$0xff]  ;;  %v361_v26 = vadd.f32 %v322_v9, %v321_v8  ;;  %v296_v28 = vsub.f32 %v232_v11, %v264_v15  ;;  %v293_v30 = vsub.f32 %v229_v16, %v261_v20 }
  0x4a   : > { %v260_v25 = vld [vmem:[%s1162_s26 + $0x98] sm:$0xff]  ;;  %v358_v29 = vadd.f32 %v320_v14, %v319_v13  ;;  %v294_v31 = vsub.f32 %v230_v17, %v262_v21  ;;  %v291_v33 = vsub.f32 %v227_v22, %v259_v24  ;;  %v327_v35 = vmul.f32 %v295_v27, %v295_v27  ;;  %v237_v37 = vld [vmem:[%s1155_s14 + $0xe0] sm:$0xff]  ;;  %v238_v38 = vld [vmem:[%s1155_s14 + $0xe8] sm:$0xff] }
  0x4b   : > { %353 = vadd.xlane.f32.xlu2 %v352_v63  ;;  %v355_v32 = vadd.f32 %v318_v19, %v317_v18  ;;  %v292_v34 = vsub.f32 %v228_v23, %v260_v25  ;;  %v328_v36 = vmul.f32 %v296_v28, %v296_v28  ;;  %v269_v39 = vld [vmem:[%s1162_s26 + $0xe0] sm:$0xff]  ;;  %v325_v40 = vmul.f32 %v293_v30, %v293_v30  ;;  %v270_v42 = vld [vmem:[%s1162_s26 + $0xe8] sm:$0xff]  ;;  %v235_v43 = vld [vmem:[%s1155_s14 + $0xd0] sm:$0xff] }
  0x4c   : > { %347 = vadd.xlane.f32.xlu1 %v346_v2  ;;  %v326_v41 = vmul.f32 %v294_v31, %v294_v31  ;;  %v236_v44 = vld [vmem:[%s1155_s14 + $0xd8] sm:$0xff]  ;;  %v323_v45 = vmul.f32 %v291_v33, %v291_v33  ;;  %v267_v47 = vld [vmem:[%s1162_s26 + $0xd0] sm:$0xff]  ;;  %v233_v49 = vld [vmem:[%s1155_s14 + $0xc0] sm:$0xff]  ;;  %v301_v54 = vsub.f32 %v237_v37, %v269_v39  ;;  %v302_v55 = vsub.f32 %v238_v38, %v270_v42 }
  0x4d   : > { %v324_v46 = vmul.f32 %v292_v34, %v292_v34  ;;  %v268_v48 = vld [vmem:[%s1162_s26 + $0xd8] sm:$0xff]  ;;  %v234_v50 = vld [vmem:[%s1155_s14 + $0xc8] sm:$0xff]  ;;  %v265_v51 = vld [vmem:[%s1162_s26 + $0xc0] sm:$0xff]  ;;  %v370_v53 = vadd.f32 %v328_v36, %v327_v35  ;;  %v299_v57 = vsub.f32 %v235_v43, %v267_v47  ;;  %v609_v20 = vlaneseq }
  0x4e   : > { %341 = vadd.xlane.f32.xlu0 %v340_v5  ;;  %v266_v52 = vld [vmem:[%s1162_s26 + $0xc8] sm:$0xff]  ;;  %v367_v56 = vadd.f32 %v326_v41, %v325_v40  ;;  %v300_v58 = vsub.f32 %v236_v44, %v268_v48  ;;  %v297_v60 = vsub.f32 %v233_v49, %v265_v51  ;;  %v333_v62 = vmul.f32 %v301_v54, %v301_v54  ;;  %v239_v4 = vld [vmem:[%s1155_s14 + $0xf0] sm:$0xff]  ;;  %v240_v5 = vld [vmem:[%s1155_s14 + $0xf8] sm:$0xff] }
  0x4f   : > { %v364_v59 = vadd.f32 %v324_v46, %v323_v45  ;;  %v298_v61 = vsub.f32 %v234_v50, %v266_v52  ;;  %v334_v63 = vmul.f32 %v302_v55, %v302_v55  ;;  %v331_v0 = vmul.f32 %v299_v57, %v299_v57  ;;  %v271_v6 = vld [vmem:[%s1162_s26 + $0xf0] sm:$0xff]  ;;  %v272_v7 = vld [vmem:[%s1162_s26 + $0xf8] sm:$0xff] }
  0x50   : > { %v332_v1 = vmul.f32 %v300_v58, %v300_v58  ;;  %v329_v2 = vmul.f32 %v297_v60, %v297_v60  ;;  %v303_v11 = vsub.f32 %v239_v4, %v271_v6  ;;  %v304_v12 = vsub.f32 %v240_v5, %v272_v7 }
  0x51   : > { %v330_v3 = vmul.f32 %v298_v61, %v298_v61  ;;  %v379_v8 = vadd.f32 %v334_v63, %v333_v62  ;;  %v1252_v30 = vand.u32 127, %v609_v20 }
  0x52   : > { %v376_v9 = vadd.f32 %v332_v1, %v331_v0  ;;  %v335_v13 = vmul.f32 %v303_v11, %v303_v11  ;;  %v336_v14 = vmul.f32 %v304_v12, %v304_v12 }
  0x53   : > { %362 = vadd.xlane.f32.xlu2 %v361_v26  ;;  %v373_v10 = vadd.f32 %v330_v3, %v329_v2  ;;  %v1256_v38 = vadd.s32 4294967264, %v1252_v30  ;;  %v1259_v39 = vadd.s32 4294967280, %v1252_v30  ;;  %v1262_v43 = vadd.s32 4294967256, %v1252_v30 }
  0x54   : > { %359 = vadd.xlane.f32.xlu1 %v358_v29  ;;  %v382_v15 = vadd.f32 %v336_v14, %v335_v13  ;;  %v1266_v45 = vadd.s32 4294967272, %v1252_v30  ;;  %v1272_v49 = vadd.s32 4294967288, %v1252_v30  ;;  %v1293_v3 = vadd.s32 4294967232, %v1252_v30 }
  0x56   : > { %356 = vadd.xlane.f32.xlu0 %v355_v32 }
  0x5b   : > { %371 = vadd.xlane.f32.xlu2 %v370_v53 }
  0x5c   : > { %368 = vadd.xlane.f32.xlu1 %v367_v56 }
  0x5e   : > { %365 = vadd.xlane.f32.xlu0 %v364_v59 }
  0x63   : > { %380 = vadd.xlane.f32.xlu2 %v379_v8  ;;  %v1297_v8 = vadd.s32 4294967240, %v1252_v30 }
  0x64   : > { %377 = vadd.xlane.f32.xlu1 %v376_v9 }
  0x66   : > { %374 = vadd.xlane.f32.xlu0 %v373_v10 }
  0x6e   : > { %383 = vadd.xlane.f32.xlu0 %v382_v15 }
  0xb6   : > { %v1232_v16 = vpop.xlane.xlu2 %350 }
  0xb7   : > { %849 = vrsqrt.f32 %v1232_v16  ;;  %v1235_v17 = vpop.xlane.xlu1 %344  ;;  %vm440_vm0 = vcmp.eq.f32.partialorder %v1232_v16, inf  ;;  %v443_v52 = vand.u32 2147483648, %v1232_v16  ;;  %vm442_vm1 = vcmp.eq.f32.partialorder %v1232_v16, 0.0 }
  0xb8   : > { %851 = vrsqrt.f32 %v1235_v17  ;;  %vm416_vm2 = vcmp.eq.f32.partialorder %v1235_v17, inf  ;;  %v419_v59 = vand.u32 2147483648, %v1235_v17  ;;  %vm418_vm4 = vcmp.eq.f32.partialorder %v1235_v17, 0.0 }
  0xb9   : > { %v1238_v18 = vpop.xlane.xlu0 %338 }
  0xba   : > { %853 = vrsqrt.f32 %v1238_v18  ;;  %vm392_vm3 = vcmp.eq.f32.partialorder %v1238_v18, inf  ;;  %vm394_vm5 = vcmp.eq.f32.partialorder %v1238_v18, 0.0  ;;  %v395_v1 = vand.u32 2147483648, %v1238_v18 }
  0xbd   : > { %v850_v19 = vpop.eup %849 }
  0xbe   : > { %v852_v21 = vpop.eup %851  ;;  %v434_v22 = vmul.f32 %v850_v19, %v1232_v16  ;;  %v1242_v23 = vpop.xlane.xlu2 %353 }
  0xbf   : > { %v410_v25 = vmul.f32 %v852_v21, %v1235_v17  ;;  %855 = vrsqrt.f32 %v1242_v23  ;;  %v1246_v26 = vpop.xlane.xlu1 %347  ;;  %vm452_vm6 = vcmp.eq.f32.partialorder %v1242_v23, inf  ;;  %v455_v10 = vand.u32 2147483648, %v1242_v23 }
  0xc0   : > { %v854_v24 = vpop.eup %853  ;;  %v435_v27 = vmul.f32 %v850_v19, %v434_v22  ;;  %857 = vrsqrt.f32 %v1246_v26  ;;  %vm454_vm7 = vcmp.eq.f32.partialorder %v1242_v23, 0.0  ;;  %vm428_vm8 = vcmp.eq.f32.partialorder %v1246_v26, inf }
  0xc1   : > { %v386_v28 = vmul.f32 %v854_v24, %v1238_v18  ;;  %v1250_v29 = vpop.xlane.xlu0 %341  ;;  %v411_v31 = vmul.f32 %v852_v21, %v410_v25  ;;  %vm430_vm9 = vcmp.eq.f32.partialorder %v1246_v26, 0.0  ;;  %v431_v20 = vand.u32 2147483648, %v1246_v26 }
  0xc2   : > { %v436_v32 = vmul.f32 0.5, %v435_v27  ;;  %859 = vrsqrt.f32 %v1250_v29  ;;  %vm404_vm10 = vcmp.eq.f32.partialorder %v1250_v29, inf  ;;  %vm406_vm12 = vcmp.eq.f32.partialorder %v1250_v29, 0.0 }
  0xc3   : > { %v387_v33 = vmul.f32 %v854_v24, %v386_v28  ;;  %v412_v34 = vmul.f32 0.5, %v411_v31 }
  0xc4   : > { %v437_v35 = vsub.f32 1.5, %v436_v32 }
  0xc5   : > { %v388_v36 = vmul.f32 0.5, %v387_v33  ;;  %v856_v37 = vpop.eup %855  ;;  %v413_v40 = vsub.f32 1.5, %v412_v34 }
  0xc6   : > { %v858_v41 = vpop.eup %857  ;;  %v446_v44 = vmul.f32 %v856_v37, %v1242_v23  ;;  %v1268_v46 = vpop.xlane.xlu2 %362  ;;  %v438_v47 = vmul.f32 %v850_v19, %v437_v35 }
  0xc7   : > { %v389_v42 = vsub.f32 1.5, %v388_v36  ;;  %v422_v48 = vmul.f32 %v858_v41, %v1246_v26  ;;  %861 = vrsqrt.f32 %v1268_v46  ;;  %v1275_v50 = vpop.xlane.xlu1 %359  ;;  %v414_v56 = vmul.f32 %v852_v21, %v413_v40 }
  0xc8   : > { %v860_v51 = vpop.eup %859  ;;  %v447_v54 = vmul.f32 %v856_v37, %v446_v44  ;;  %863 = vrsqrt.f32 %v1275_v50  ;;  %v439_v61 = vmul.f32 %v438_v47, %v1232_v16  ;;  %vm488_vm15 = vcmp.eq.f32.partialorder %v1268_v46, inf }
  0xc9   : > { %v390_v53 = vmul.f32 %v854_v24, %v389_v42  ;;  %v1279_v55 = vpop.xlane.xlu0 %356  ;;  %v423_v57 = vmul.f32 %v858_v41, %v422_v48  ;;  %v398_v58 = vmul.f32 %v860_v51, %v1250_v29  ;;  %v415_v5 = vmul.f32 %v414_v56, %v1235_v17 }
  0xca   : > { %v448_v60 = vmul.f32 0.5, %v447_v54  ;;  %v441_v12 = vsel %vm440_vm0, %v1232_v16, %v439_v61  ;;  %865 = vrsqrt.f32 %v1279_v55  ;;  %v407_v16 = vand.u32 2147483648, %v1250_v29 }
  0xcb   : > { %v424_v62 = vmul.f32 0.5, %v423_v57  ;;  %v399_v63 = vmul.f32 %v860_v51, %v398_v58  ;;  %v391_v0 = vmul.f32 %v390_v53, %v1238_v18  ;;  %v417_v22 = vsel %vm416_vm2, %v1235_v17, %v415_v5 }
  0xcc   : > { %v449_v2 = vsub.f32 1.5, %v448_v60  ;;  %v444_v31 = vsel %vm442_vm1, %v443_v52, %v441_v12  ;;  %v420_v40 = vsel %vm418_vm4, %v419_v59, %v417_v22  ;;  %v1334_v42 = vadd.s32 4294967248, %v1252_v30 }
  0xcd   : > { %v862_v4 = vpop.eup %861  ;;  %v425_v6 = vsub.f32 1.5, %v424_v62  ;;  %v400_v7 = vmul.f32 0.5, %v399_v63  ;;  %v393_v19 = vsel %vm392_vm3, %v1238_v18, %v391_v0  ;;  %v581_v44 = vsub.f32 0.0, %v444_v31 }
  0xce   : > { %v450_v9 = vmul.f32 %v856_v37, %v449_v2  ;;  %v482_v11 = vmul.f32 %v862_v4, %v1268_v46  ;;  %v864_v15 = vpop.eup %863  ;;  %v396_v34 = vsel %vm394_vm5, %v395_v1, %v393_v19  ;;  %v1328_v37 = vpop.xlane.xlu2 %371  ;;  %v579_v56 = vsub.f32 0.0, %v420_v40 }
  0xcf   : > { %v426_v13 = vmul.f32 %v858_v41, %v425_v6  ;;  %v401_v14 = vsub.f32 1.5, %v400_v7  ;;  %v470_v27 = vmul.f32 %v864_v15, %v1275_v50  ;;  %v1345_v54 = vpop.xlane.xlu1 %368  ;;  %867 = vrsqrt.f32 %v1328_v37 }
  0xd0   : > { %v483_v21 = vmul.f32 %v862_v4, %v482_v11  ;;  %v451_v24 = vmul.f32 %v450_v9, %v1242_v23  ;;  %v866_v59 = vpop.eup %865  ;;  %vm490_vm0 = vcmp.eq.f32.partialorder %v1268_v46, 0.0  ;;  %v625_v1 = vperm.slane %v581_v44, %v1256_v38 }
  0xd1   : > { %v402_v25 = vmul.f32 %v860_v51, %v401_v14  ;;  %v1318_v28 = vpop.xlane.xlu0 %365  ;;  %v427_v32 = vmul.f32 %v426_v13, %v1246_v26  ;;  %v471_v36 = vmul.f32 %v864_v15, %v470_v27  ;;  %v577_v51 = vsub.f32 0.0, %v396_v34 }
  0xd2   : > { %v484_v33 = vmul.f32 0.5, %v483_v21  ;;  %v453_v18 = vsel %vm452_vm6, %v1242_v23, %v451_v24  ;;  %v458_v0 = vmul.f32 %v866_v59, %v1279_v55  ;;  %v491_v23 = vand.u32 2147483648, %v1268_v46 }
  0xd3   : > { %v403_v35 = vmul.f32 %v402_v25, %v1250_v29  ;;  %v472_v48 = vmul.f32 0.5, %v471_v36  ;;  %v429_v17 = vsel %vm428_vm8, %v1246_v26, %v427_v32  ;;  %v611_v2 = vperm.slane %v577_v51, %v1252_v30 }
  0xd4   : > { %v485_v41 = vsub.f32 1.5, %v484_v33  ;;  %v432_v61 = vsel %vm430_vm9, %v431_v20, %v429_v17  ;;  %vm626_vm1 = vcmask 326912   ;;  %869 = vrsqrt.f32 %v1345_v54 }
  0xd5   : > { %v405_v47 = vsel %vm404_vm10, %v1250_v29, %v403_v35  ;;  %v473_v58 = vsub.f32 1.5, %v472_v48  ;;  %v456_v29 = vsel %vm454_vm7, %v455_v10, %v453_v18  ;;  %vm476_vm2 = vcmp.eq.f32.partialorder %v1275_v50, inf  ;;  %v868_v10 = vpop.eup %867 }
  0xd6   : > { %v408_v52 = vsel %vm406_vm12, %v407_v16, %v405_v47  ;;  %v486_v53 = vmul.f32 %v862_v4, %v485_v41  ;;  %v617_v4 = vperm.slane %v579_v56, %v1259_v39  ;;  %v582_v5 = vsub.f32 0.0, %v456_v29  ;;  %v1373_v12 = vpop.xlane.xlu2 %380 }
  0xd7   : > { %v578_v57 = vsub.f32 0.0, %v408_v52  ;;  %v474_v63 = vmul.f32 %v864_v15, %v473_v58  ;;  %v459_v26 = vmul.f32 %v866_v59, %v458_v0  ;;  %vm478_vm3 = vcmp.eq.f32.partialorder %v1275_v50, 0.0  ;;  %v1388_v31 = vpop.xlane.xlu1 %377 }
  0xd8   : > { %v487_v60 = vmul.f32 %v486_v53, %v1268_v46  ;;  %v479_v39 = vand.u32 2147483648, %v1275_v50  ;;  %vm630_vm4 = vcmask 392512   ;;  %871 = vrsqrt.f32 %v1318_v28 }
  0xd9   : > { %v613_v62 = vperm.slane %v578_v57, %v1272_v49  ;;  %v1363_v6 = vpop.xlane.xlu0 %374  ;;  %v580_v49 = vsub.f32 0.0, %v432_v61  ;;  %v475_v9 = vmul.f32 %v474_v63, %v1275_v50  ;;  %v460_v11 = vmul.f32 0.5, %v459_v26 }
  0xda   : > { %v489_v38 = vsel %vm488_vm15, %v1268_v46, %v487_v60  ;;  %vm464_vm5 = vcmp.eq.f32.partialorder %v1279_v55, inf  ;;  %vm466_vm6 = vcmp.eq.f32.partialorder %v1279_v55, 0.0  ;;  %v467_v13 = vand.u32 2147483648, %v1279_v55  ;;  %v870_v22 = vpop.eup %869 }
  0xdb   : > { %v615_v7 = vsel %vm614_vm11, %v613_v62, %v611_v2  ;;  %v518_v14 = vmul.f32 %v868_v10, %v1328_v37  ;;  %v629_v15 = vperm.slane %v582_v5, %v1262_v43  ;;  %v492_v20 = vsel %vm490_vm0, %v491_v23, %v489_v38 }
  0xdc   : > { %v619_v19 = vsel %vm618_vm13, %v617_v4, %v615_v7  ;;  %v461_v21 = vsub.f32 1.5, %v460_v11  ;;  %v621_v24 = vperm.slane %v580_v49, %v1266_v45  ;;  %v477_v25 = vsel %vm476_vm2, %v1275_v50, %v475_v9 }
  0xdd   : > { %v519_v27 = vmul.f32 %v868_v10, %v518_v14  ;;  %873 = vrsqrt.f32 %v1373_v12  ;;  %v1391_v43 = vadd.s32 4294967208, %v1252_v30  ;;  %v527_v46 = vand.u32 2147483648, %v1328_v37 }
  0xde   : > { %v462_v32 = vmul.f32 %v866_v59, %v461_v21  ;;  %v506_v33 = vmul.f32 %v870_v22, %v1345_v54  ;;  %v623_v34 = vsel %vm622_vm14, %v621_v24, %v619_v19  ;;  %v585_v45 = vsub.f32 0.0, %v492_v20  ;;  %v872_v40 = vpop.eup %871 }
  0xdf   : > { %v520_v35 = vmul.f32 0.5, %v519_v27  ;;  %v1397_v36 = vadd.s32 4294967216, %v1252_v30  ;;  %v480_v16 = vsel %vm478_vm3, %v479_v39, %v477_v25  ;;  %875 = vrsqrt.f32 %v1388_v31 }
  0xe0   : > { %v463_v41 = vmul.f32 %v462_v32, %v1279_v55  ;;  %v507_v44 = vmul.f32 %v870_v22, %v506_v33  ;;  %vm512_vm7 = vcmp.eq.f32.partialorder %v1345_v54, inf  ;;  %v515_v47 = vand.u32 2147483648, %v1345_v54 }
  0xe1   : > { %v521_v18 = vsub.f32 1.5, %v520_v35  ;;  %v494_v48 = vmul.f32 %v872_v40, %v1318_v28  ;;  %v627_v51 = vsel %vm626_vm1, %v625_v1, %v623_v34  ;;  %vm634_vm8 = vcmask 458112   ;;  %v1411_v52 = vpop.xlane.xlu0 %383 }
  0xe2   : > { %v465_v50 = vsel %vm464_vm5, %v1279_v55, %v463_v41  ;;  %v508_v17 = vmul.f32 0.5, %v507_v44  ;;  %877 = vrsqrt.f32 %v1363_v6  ;;  %v584_v56 = vsub.f32 0.0, %v480_v16 }
  0xe3   : > { %v874_v53 = vpop.eup %873  ;;  %v468_v57 = vsel %vm466_vm6, %v467_v13, %v465_v50  ;;  %vm514_vm9 = vcmp.eq.f32.partialorder %v1345_v54, 0.0  ;;  %v1417_v58 = vadd.s32 4294967224, %v1252_v30  ;;  %v495_v59 = vmul.f32 %v872_v40, %v494_v48 }
  0xe4   : > { %v1420_v29 = vperm.slane %v585_v45, %v1293_v3  ;;  %v522_v60 = vmul.f32 %v868_v10, %v521_v18  ;;  %vm524_vm10 = vcmp.eq.f32.partialorder %v1328_v37, inf  ;;  %v509_v61 = vsub.f32 1.5, %v508_v17 }
  0xe5   : > { %v554_v62 = vmul.f32 %v874_v53, %v1373_v12  ;;  %v631_v63 = vsel %vm630_vm4, %v629_v15, %v627_v51  ;;  %v583_v0 = vsub.f32 0.0, %v468_v57  ;;  %v496_v55 = vmul.f32 0.5, %v495_v59  ;;  %v876_v1 = vpop.eup %875 }
  0xe6   : > { %879 = vrsqrt.f32 %v1411_v52  ;;  %v510_v2 = vmul.f32 %v870_v22, %v509_v61  ;;  %vm500_vm11 = vcmp.eq.f32.partialorder %v1318_v28, inf  ;;  %vm502_vm12 = vcmp.eq.f32.partialorder %v1318_v28, 0.0 }
  0xe7   : > { %v555_v3 = vmul.f32 %v874_v53, %v554_v62  ;;  %v637_v23 = vperm.slane %v584_v56, %v1297_v8  ;;  %vm526_vm13 = vcmp.eq.f32.partialorder %v1328_v37, 0.0  ;;  %v497_v4 = vsub.f32 1.5, %v496_v55 }
  0xe8   : > { %v503_v5 = vand.u32 2147483648, %v1318_v28  ;;  %v542_v26 = vmul.f32 %v876_v1, %v1388_v31  ;;  %v878_v49 = vpop.eup %877  ;;  %v523_v7 = vmul.f32 %v522_v60, %v1328_v37  ;;  %v511_v38 = vmul.f32 %v510_v2, %v1345_v54 }
  0xe9   : > { %v556_v9 = vmul.f32 0.5, %v555_v3  ;;  %v563_v10 = vand.u32 2147483648, %v1373_v12  ;;  %v633_v39 = vperm.slane %v583_v0, %v1334_v42  ;;  %v498_v11 = vmul.f32 %v872_v40, %v497_v4 }
  0xea   : > { %vm560_vm14 = vcmp.eq.f32.partialorder %v1373_v12, inf  ;;  %v543_v8 = vmul.f32 %v876_v1, %v542_v26  ;;  %v530_v13 = vmul.f32 %v878_v49, %v1363_v6  ;;  %v513_v14 = vsel %vm512_vm7, %v1345_v54, %v511_v38 }
  0xeb   : > { %v557_v15 = vsub.f32 1.5, %v556_v9  ;;  %v1442_v19 = vadd.s32 4294967192, %v1252_v30  ;;  %vm548_vm15 = vcmp.eq.f32.partialorder %v1388_v31, inf  ;;  %v499_v21 = vmul.f32 %v498_v11, %v1318_v28 }
  0xec   : > { %v880_v20 = vpop.eup %879  ;;  %v544_v42 = vmul.f32 0.5, %v543_v8  ;;  %vm550_vm0 = vcmp.eq.f32.partialorder %v1388_v31, 0.0  ;;  %v551_v22 = vand.u32 2147483648, %v1388_v31  ;;  %v516_v24 = vsel %vm514_vm9, %v515_v47, %v513_v14 }
  0xed   : > { %v558_v25 = vmul.f32 %v874_v53, %v557_v15  ;;  %vm562_vm1 = vcmp.eq.f32.partialorder %v1373_v12, 0.0  ;;  %v531_v27 = vmul.f32 %v878_v49, %v530_v13  ;;  %v566_v32 = vmul.f32 %v880_v20, %v1411_v52 }
  0xee   : > { %v635_v33 = vsel %vm634_vm8, %v633_v39, %v631_v63  ;;  %v525_v34 = vsel %vm524_vm10, %v1328_v37, %v523_v7  ;;  %v501_v45 = vsel %vm500_vm11, %v1318_v28, %v499_v21  ;;  %v545_v35 = vsub.f32 1.5, %v544_v42 }
  0xef   : > { %vm536_vm2 = vcmp.eq.f32.partialorder %v1363_v6, inf  ;;  %v504_v54 = vsel %vm502_vm12, %v503_v5, %v501_v45  ;;  %v559_v40 = vmul.f32 %v558_v25, %v1373_v12  ;;  %v532_v16 = vmul.f32 0.5, %v531_v27 }
  0xf0   : > { %vm538_vm3 = vcmp.eq.f32.partialorder %v1363_v6, 0.0  ;;  %vm638_vm4 = vcmask 523712   ;;  %v587_v41 = vsub.f32 0.0, %v516_v24  ;;  %v586_v44 = vsub.f32 0.0, %v504_v54 }
  0xf1   : > { %v546_v18 = vmul.f32 %v876_v1, %v545_v35  ;;  %v567_v47 = vmul.f32 %v880_v20, %v566_v32  ;;  %v528_v48 = vsel %vm526_vm13, %v527_v46, %v525_v34  ;;  %v533_v51 = vsub.f32 1.5, %v532_v16 }
  0xf2   : > { %v539_v50 = vand.u32 2147483648, %v1363_v6  ;;  %vm642_vm5 = vcmask 589312   ;;  %v645_v28 = vperm.slane %v586_v44, %v1417_v58  ;;  %v639_v56 = vsel %vm638_vm4, %v637_v23, %v635_v33 }
  0xf3   : > { %v547_v17 = vmul.f32 %v546_v18, %v1388_v31  ;;  %v568_v53 = vmul.f32 0.5, %v567_v47  ;;  %v561_v57 = vsel %vm560_vm14, %v1373_v12, %v559_v40  ;;  %v534_v59 = vmul.f32 %v878_v49, %v533_v51 }
  0xf4   : > { %vm572_vm6 = vcmp.eq.f32.partialorder %v1411_v52, inf  ;;  %vm646_vm7 = vcmask 654912   ;;  %v588_v37 = vsub.f32 0.0, %v528_v48  ;;  %v649_v46 = vperm.slane %v587_v41, %v1397_v36 }
  0xf5   : > { %v549_v60 = vsel %vm548_vm15, %v1388_v31, %v547_v17  ;;  %v569_v58 = vsub.f32 1.5, %v568_v53  ;;  %v535_v62 = vmul.f32 %v534_v59, %v1363_v6  ;;  %v643_v63 = vsel %vm642_vm5, %v1420_v29, %v639_v56 }
  0xf6   : > { %v552_v61 = vsel %vm550_vm0, %v551_v22, %v549_v60  ;;  %vm650_vm8 = vcmask 720512   ;;  %v564_v0 = vsel %vm562_vm1, %v563_v10, %v561_v57  ;;  %v647_v36 = vsel %vm646_vm7, %v645_v28, %v643_v63 }
  0xf7   : > { %v590_v55 = vsub.f32 0.0, %v552_v61  ;;  %v570_v1 = vmul.f32 %v880_v20, %v569_v58  ;;  %v537_v2 = vsel %vm536_vm2, %v1363_v6, %v535_v62  ;;  %vm574_vm9 = vcmp.eq.f32.partialorder %v1411_v52, 0.0 }
  0xf8   : > { %v575_v31 = vand.u32 2147483648, %v1411_v52  ;;  %v656_v3 = vadd.s32 4294967200, %v1252_v30  ;;  %v653_v29 = vperm.slane %v588_v37, %v1391_v43  ;;  %v540_v12 = vsel %vm538_vm3, %v539_v50, %v537_v2 }
  0xf9   : > { %v571_v23 = vmul.f32 %v570_v1, %v1411_v52  ;;  %vm654_vm10 = vcmask 786112   ;;  %v591_v4 = vsub.f32 0.0, %v564_v0  ;;  %v589_v5 = vsub.f32 0.0, %v540_v12 }
  0xfa   : > { %v651_v26 = vsel %vm650_vm8, %v649_v46, %v647_v36  ;;  %v664_v49 = vadd.s32 4294967184, %v1252_v30  ;;  %v661_v7 = vperm.slane %v590_v55, %v1442_v19  ;;  %vm658_vm11 = vcmask 851712  }
  0xfb   : > { %v573_v6 = vsel %vm572_vm6, %v1411_v52, %v571_v23  ;;  %v668_v43 = vadd.s32 4294967176, %v1252_v30  ;;  %v657_v9 = vperm.slane %v589_v5, %v656_v3  ;;  %vm662_vm12 = vcmask 917312  }
  0xfc   : > { %v576_v38 = vsel %vm574_vm9, %v575_v31, %v573_v6  ;;  %v655_v39 = vsel %vm654_vm10, %v653_v29, %v651_v26  ;;  %vm666_vm13 = vcmask 982912   ;;  %v665_v8 = vperm.slane %v591_v4, %v664_v49 }
  0xfd   : > { %v592_v10 = vsub.f32 0.0, %v576_v38  ;;  %v659_v11 = vsel %vm658_vm11, %v657_v9, %v655_v39  ;;  %vm670_vm14 = vcmask 1048512  }
  0xfe   : > { %v663_v13 = vsel %vm662_vm12, %v661_v7, %v659_v11 }
  0xff   : > { %v669_v14 = vperm.slane %v592_v10, %v668_v43  ;;  %v667_v15 = vsel %vm666_vm13, %v665_v8, %v663_v13 }
 0x101   : > { %v671_v30 = vsel %vm670_vm14, %v669_v14, %v667_v15 }
 0x102   : > { %673 = vst [vmem:[%s206_s8] sm:$0x1] %v671_v30 }
 0x103   : > { %968 = shalt.err (!%p965_p13)
}
 0x104   : > { %800 = dma.vmem_to_hbm [thread:$0]  (%p1079_p10), %s686_s13, 16, %s688_s16, %s675_s17  }
 0x105 PF: > { %p814_p0 = scmp.ge.s32.totalorder %s1011_s12, 2  ;;  %s699_s23 = sand.u32 1, %s999_s9  }
 0x106   : > { %s700_s25 = scalar_lea.sflag [#allocation4], %s699_s23 }
 0x107   : > { %p810_p4 = pnand %p814_p0, %p1083_p11 }
 0x109   : > { %p811_p5 = pneg %p810_p4 }
 0x10b   : > { %994 = dma.done.wait (%p811_p5), %s700_s25, 16  }
 0x10c   : > { %996 = vsyncadd (%p811_p5), %s700_s25, 4294967280  ;;  %p18_p7 = scmp.ge.s32.totalorder %s1055_s15, 10   ;;  %s1545_s9 = smov %s1003_s10 }
 0x10d   : > { %s1546_s10 = smov %s1007_s11  ;;  %s1547_s11 = smov %s1067_s18 }
 0x10e   : > { %s1548_s12 = smov %s1055_s15  ;;  %20 = sbr.rel (!%p18_p7) target bundleno = 7 (0x7), region = 86 }
 0x113   :  { %705 = vsyncpa [#allocation3], 1 }
 0x114   :  { %707 = vsyncpa [#allocation3 + $0x1], 1 }
 0x115   :  { %708 = vsyncpa [#allocation6], 1 }
 0x116   :  { %710 = vsyncpa [#allocation6 + $0x1], 1 }
 0x117   :  { %711 = vsyncpa [#allocation4], 1 }
 0x118   :  { %713 = vsyncpa [#allocation4 + $0x1], 1 }

</bundles_post_ra>
